<compile_context>
chip_gen: v7x
topology: tpu7x:2x2x1
jax: 0.10.0
libtpu: 0.0.40
codegen_flags: <defaults>
</compile_context>

<pallas_src>
import functools

import jax
import jax.numpy as jnp
from jax.experimental import pallas as pl
from jax.experimental.pallas import tpu as pltpu


def _round_up(x, m):
    return ((x + m - 1) // m) * m


# ---------------------------------------------------------------------------
# Kernels
# ---------------------------------------------------------------------------
def _vae_kernel_slab(x_ref, we_ref, be_ref, wd_ref, bd_ref, dec_ref, enc_ref,
                     *, lk):
    """Small-L variant: mean | logv | pad emitted as one lane-dense slab."""
    x = x_ref[...]                                               # [TB, H]
    # Fused encoder GEMM: cols [0:L]=mean, [L:2L]=logv, [2L:Lp]=0.
    enc = jnp.dot(x, we_ref[...], preferred_element_type=jnp.float32)
    enc = enc + be_ref[...]                                      # [TB, Lp] f32
    # Decoder GEMM on the 128-aligned K slice.  Rows [L:Lk] of W_dec are zero,
    # so logv / pad columns contribute nothing: dec == mean @ W_dec + b_dec.
    z = enc[:, :lk].astype(wd_ref.dtype)                         # static slice
    dec = jnp.dot(z, wd_ref[...], preferred_element_type=jnp.float32)
    dec = dec + bd_ref[...]                                      # [TB, H] f32
    enc_ref[...] = enc.astype(enc_ref.dtype)
    dec_ref[...] = dec.astype(dec_ref.dtype)


def _vae_kernel_split(x_ref, we_ref, be_ref, wd_ref, bd_ref,
                      dec_ref, mean_ref, logv_ref, *, l):
    """L % 128 == 0 variant: mean / logv written as separate lane-dense outs."""
    x = x_ref[...]
    enc = jnp.dot(x, we_ref[...], preferred_element_type=jnp.float32)
    enc = enc + be_ref[...]                                      # [TB, 2L] f32
    mean = enc[:, :l]
    logv = enc[:, l:2 * l]
    dec = jnp.dot(mean.astype(wd_ref.dtype), wd_ref[...],
                  preferred_element_type=jnp.float32)
    dec = dec + bd_ref[...]
    mean_ref[...] = mean.astype(mean_ref.dtype)
    logv_ref[...] = logv.astype(logv_ref.dtype)
    dec_ref[...] = dec.astype(dec_ref.dtype)


# ---------------------------------------------------------------------------
# Weight packing (done once, outside the jitted forward)
# ---------------------------------------------------------------------------
def pack_vae_params(w_mean, b_mean, w_logv, b_logv, w_dec, b_dec,
                    *, compute_dtype=None):
    """Pack / pad weights once.

    w_mean, w_logv: [H, L] (transposed nn.Linear weights), biases [1, L].
    w_dec: [L, H] (transposed), b_dec: [1, H].
    Returns (w_enc [H,Lp], b_enc [1,Lp] f32, w_dec_p [Lk,H], b_dec [1,H] f32).
    """
    H, L = w_mean.shape
    Lp = max(128, _round_up(2 * L, 128))       # fused encoder output slab width
    Lk = max(128, _round_up(L, 128))           # decoder contraction dim only
    w_enc = jnp.concatenate([w_mean, w_logv], axis=1)            # [H, 2L]
    w_enc = jnp.pad(w_enc, ((0, 0), (0, Lp - 2 * L)))            # [H, Lp]
    b_enc = jnp.concatenate([b_mean.reshape(1, L),
                             b_logv.reshape(1, L)], axis=1)      # [1, 2L]
    b_enc = jnp.pad(b_enc, ((0, 0), (0, Lp - 2 * L)))            # [1, Lp]
    w_dec_p = jnp.pad(w_dec, ((0, Lk - L), (0, 0)))              # [Lk, H]
    b_dec = b_dec.reshape(1, H)
    if compute_dtype is not None:              # operands only; biases stay f32
        w_enc = w_enc.astype(compute_dtype)
        w_dec_p = w_dec_p.astype(compute_dtype)
    return w_enc, b_enc, w_dec_p, b_dec


def _choose_tiles(B, block_b):
    """Row tile that divides the 8-rounded batch; >= 2 tiles for v7x megacore."""
    Bp = _round_up(B, 8)
    tb = min(_round_up(min(int(block_b), Bp), 8), Bp)
    while Bp % tb:
        tb -= 8
    # v7x megacore: prefer an even grid of >= 2 tiles when each half is >= 256.
    if Bp // tb < 2 and Bp % 16 == 0 and Bp // 2 >= 256:
        tb = Bp // 2
    return tb, Bp


def _resident_spec(shape):
    """Grid-invariant, VMEM-resident operand: single-buffered (no 2x VMEM)."""
    return pl.BlockSpec(shape, lambda i: (0, 0), pipeline_mode=pl.Buffered(1))


# ---------------------------------------------------------------------------
# Forward
# ---------------------------------------------------------------------------
@functools.partial(jax.jit,
                   static_argnames=("latent_size", "block_b", "out_dtype"))
def vae_forward(x, w_enc, b_enc, w_dec_p, b_dec, *, latent_size,
                block_b=256, out_dtype=jnp.float32):
    """x: [B, H].  Packed weights come from pack_vae_params.

    Returns (dec [B,H] out_dtype, mean [B,L] f32, logv [B,L] f32, z [B,L] f32).
    """
    B, H = x.shape
    L = int(latent_size)
    Lp = w_enc.shape[1]
    Lk = w_dec_p.shape[0]

    # MXU operands match the (possibly reduced-precision) weight dtype.
    if x.dtype != w_enc.dtype:
        x = x.astype(w_enc.dtype)

    TB, Bp = _choose_tiles(B, block_b)
    if Bp != B:
        x = jnp.pad(x, ((0, Bp - B), (0, 0)))
    grid = (Bp // TB,)

    in_specs = [
        pl.BlockSpec((TB, H), lambda i: (i, 0)),   # x (streamed, double-buffered)
        _resident_spec((H, Lp)),                   # W_enc (resident)
        _resident_spec((1, Lp)),                   # b_enc (resident)
        _resident_spec((Lk, H)),                   # W_dec (resident, K = Lk only)
        _resident_spec((1, H)),                    # b_dec (resident)
    ]

    # Explicit VMEM budget from the actual tile footprint (v5e default is only
    # 16 MiB scoped); capped at 64 MiB (v7x physical per-TC VMEM).
    x_bytes = jnp.dtype(x.dtype).itemsize
    w_bytes = jnp.dtype(w_enc.dtype).itemsize
    dec_bytes = jnp.dtype(out_dtype).itemsize
    stream = 2 * TB * H * (x_bytes + dec_bytes) + 2 * TB * Lp * 4
    resident = (H * Lp + Lk * H) * w_bytes + (Lp + H) * 4
    vmem_limit = int(min(64 << 20, max(32 << 20, 2 * (stream + resident))))
    cparams = pltpu.CompilerParams(dimension_semantics=("parallel",),
                                   vmem_limit_bytes=vmem_limit)

    if L % 128 == 0:
        # mean / logv as separate lane-dense outputs (no wrapper re-slice).
        kernel = functools.partial(_vae_kernel_split, l=L)
        dec, mean, logv = pl.pallas_call(
            kernel,
            out_shape=(
                jax.ShapeDtypeStruct((Bp, H), out_dtype),
                jax.ShapeDtypeStruct((Bp, L), jnp.float32),
                jax.ShapeDtypeStruct((Bp, L), jnp.float32),
            ),
            grid=grid,
            in_specs=in_specs,
            out_specs=(
                pl.BlockSpec((TB, H), lambda i: (i, 0)),
                pl.BlockSpec((TB, L), lambda i: (i, 0)),
                pl.BlockSpec((TB, L), lambda i: (i, 0)),
            ),
            compiler_params=cparams,
        )(x, w_enc, b_enc, w_dec_p, b_dec)
        dec, mean, logv = dec[:B], mean[:B], logv[:B]
    else:
        # tiny L: one lane-dense slab, sliced lazily in the wrapper.
        kernel = functools.partial(_vae_kernel_slab, lk=Lk)
        dec, enc = pl.pallas_call(
            kernel,
            out_shape=(
                jax.ShapeDtypeStruct((Bp, H), out_dtype),
                jax.ShapeDtypeStruct((Bp, Lp), jnp.float32),
            ),
            grid=grid,
            in_specs=in_specs,
            out_specs=(
                pl.BlockSpec((TB, H), lambda i: (i, 0)),
                pl.BlockSpec((TB, Lp), lambda i: (i, 0)),
            ),
            compiler_params=cparams,
        )(x, w_enc, b_enc, w_dec_p, b_dec)
        dec = dec[:B]
        mean = enc[:B, :L]
        logv = enc[:B, L:2 * L]

    z = mean  # reference overwrites the reparameterized sample with mean
    # TODO(synk): true VAE sampling (z = eps*std + mean) is dead code in the
    # reference; add pltpu.prng_seed/prng_random_bits if it is ever needed.
    return dec, mean, logv, z


def init_params(key, n_embd, latent_size):
    """Deterministic synthetic parameters matching nn.Linear shapes."""
    H = n_embd * 2
    L = latent_size
    k1, k2, k3, k4, k5, k6 = jax.random.split(key, 6)
    # nn.Linear(H, L) weight is [L, H]; stored transposed [H, L] for x @ W.
    w_mean = jax.random.normal(k1, (H, L), jnp.float32) * 0.02
    b_mean = jax.random.normal(k2, (1, L), jnp.float32) * 0.02
    w_logv = jax.random.normal(k3, (H, L), jnp.float32) * 0.02
    b_logv = jax.random.normal(k4, (1, L), jnp.float32) * 0.02
    # nn.Linear(L, H) weight is [H, L]; stored transposed [L, H].
    w_dec = jax.random.normal(k5, (L, H), jnp.float32) * 0.02
    b_dec = jax.random.normal(k6, (1, H), jnp.float32) * 0.02
    return w_mean, b_mean, w_logv, b_logv, w_dec, b_dec


if __name__ == "__main__":
    hi_dot = functools.partial(jnp.dot, precision=jax.lax.Precision.HIGHEST)

    # --- tiny config consistent with the reference module -------------------
    n_embd = 32          # gpt2_config.n_embd (small synthetic)
    latent_size = 16     # vae_config.latent_size
    batch = 2
    H = n_embd * 2

    key = jax.random.PRNGKey(0)
    kx, kp = jax.random.split(key)
    x = jax.random.normal(kx, (batch, H), jnp.float32)
    params = init_params(kp, n_embd, latent_size)
    w_mean, b_mean, w_logv, b_logv, w_dec, b_dec = params

    # f32 path (strict check).
    packed = pack_vae_params(*params)
    dec, mean, logv, z = vae_forward(x, *packed, latent_size=latent_size)
    jax.block_until_ready((dec, mean, logv, z))

    mean_ref = hi_dot(x, w_mean) + b_mean
    logv_ref = hi_dot(x, w_logv) + b_logv
    dec_ref = hi_dot(mean_ref, w_dec) + b_dec
    assert jnp.allclose(mean, mean_ref, atol=1e-4)
    assert jnp.allclose(logv, logv_ref, atol=1e-4)
    assert jnp.allclose(dec, dec_ref, atol=1e-4)
    assert jnp.allclose(z, mean_ref, atol=1e-4)

    # bf16-operand path with bf16 dec writeback (f32 accumulation), loose check.
    packed16 = pack_vae_params(*params, compute_dtype=jnp.bfloat16)
    dec16, mean16, logv16, z16 = vae_forward(
        x, *packed16, latent_size=latent_size, out_dtype=jnp.bfloat16)
    jax.block_until_ready((dec16, mean16, logv16, z16))
    assert jnp.allclose(mean16, mean_ref, atol=5e-2, rtol=5e-2)
    assert jnp.allclose(logv16, logv_ref, atol=5e-2, rtol=5e-2)
    assert jnp.allclose(dec16.astype(jnp.float32), dec_ref, atol=5e-2, rtol=5e-2)

    # Larger shape: exercises the split (L % 128 == 0) path and a >=2-tile grid.
    n_embd2, latent2, batch2 = 128, 128, 512
    H2 = n_embd2 * 2
    kx2, kp2 = jax.random.split(jax.random.PRNGKey(1))
    x2 = jax.random.normal(kx2, (batch2, H2), jnp.float32)
    params2 = init_params(kp2, n_embd2, latent2)
    w_mean2, b_mean2, w_logv2, b_logv2, w_dec2, b_dec2 = params2
    packed2 = pack_vae_params(*params2)
    dec2, mean2, logv2, z2 = vae_forward(x2, *packed2, latent_size=latent2)
    jax.block_until_ready((dec2, mean2, logv2, z2))
    mean2_ref = hi_dot(x2, w_mean2) + b_mean2
    logv2_ref = hi_dot(x2, w_logv2) + b_logv2
    dec2_ref = hi_dot(mean2_ref, w_dec2) + b_dec2
    assert jnp.allclose(mean2, mean2_ref, atol=1e-3, rtol=1e-3)
    assert jnp.allclose(logv2, logv2_ref, atol=1e-3, rtol=1e-3)
    assert jnp.allclose(dec2, dec2_ref, atol=1e-3, rtol=1e-3)
    assert jnp.allclose(z2, mean2_ref, atol=1e-3, rtol=1e-3)

    print("KERNEL_OK")
</pallas_src>

<mosaic_0001>
module attributes {stable_mosaic.version = 11 : i64} {
  func.func @_vae_kernel_slab(%arg0: i32, %arg1: memref<8x64xf32, #tpu.memory_space<vmem>>, %arg2: memref<64x128xf32, #tpu.memory_space<vmem>>, %arg3: memref<1x128xf32, #tpu.memory_space<vmem>>, %arg4: memref<128x64xf32, #tpu.memory_space<vmem>>, %arg5: memref<1x64xf32, #tpu.memory_space<vmem>>, %arg6: memref<8x64xf32, #tpu.memory_space<vmem>>, %arg7: memref<8x128xf32, #tpu.memory_space<vmem>>) attributes {dimension_semantics = [#tpu.dimension_semantics<parallel>], iteration_bounds = array<i64: 1>, scalar_prefetch = 0 : i64, scratch_operands = 0 : i64, tpu.core_type = #tpu.core_type<tc>, window_params = [{transform_indices = @transform_0, window_bounds = array<i64: 8, 64>}, {pipeline_mode = #tpu.pipeline_mode<synchronous>, transform_indices = @transform_1, window_bounds = array<i64: 64, 128>}, {pipeline_mode = #tpu.pipeline_mode<synchronous>, transform_indices = @transform_2, window_bounds = array<i64: 1, 128>}, {pipeline_mode = #tpu.pipeline_mode<synchronous>, transform_indices = @transform_3, window_bounds = array<i64: 128, 64>}, {pipeline_mode = #tpu.pipeline_mode<synchronous>, transform_indices = @transform_4, window_bounds = array<i64: 1, 64>}, {transform_indices = @transform_5, window_bounds = array<i64: 8, 64>}, {transform_indices = @transform_6, window_bounds = array<i64: 8, 128>}]} {
    %c0 = arith.constant 0 : index
    %c0_0 = arith.constant 0 : index
    %0 = vector.load %arg1[%c0, %c0_0] : memref<8x64xf32, #tpu.memory_space<vmem>>, vector<8x64xf32>
    %c0_1 = arith.constant 0 : index
    %c0_2 = arith.constant 0 : index
    %1 = vector.load %arg2[%c0_1, %c0_2] : memref<64x128xf32, #tpu.memory_space<vmem>>, vector<64x128xf32>
    %cst = arith.constant dense<0.000000e+00> : vector<8x128xf32>
    %2 = tpu.matmul %0, %1, %cst {dimension_numbers = #tpu.dot_dimension_numbers<[1], [0], [0], [1], [0, 0, 1, 1], [], []>} : vector<8x64xf32>, vector<64x128xf32>, vector<8x128xf32> -> vector<8x128xf32>
    %c0_3 = arith.constant 0 : index
    %c0_4 = arith.constant 0 : index
    %3 = vector.load %arg3[%c0_3, %c0_4] : memref<1x128xf32, #tpu.memory_space<vmem>>, vector<1x128xf32>
    %4 = vector.broadcast %3 : vector<1x128xf32> to vector<8x128xf32>
    %5 = arith.addf %2, %4 : vector<8x128xf32>
    %c0_5 = arith.constant 0 : index
    %c0_6 = arith.constant 0 : index
    %6 = vector.load %arg4[%c0_5, %c0_6] : memref<128x64xf32, #tpu.memory_space<vmem>>, vector<128x64xf32>
    %cst_7 = arith.constant dense<0.000000e+00> : vector<8x64xf32>
    %7 = tpu.matmul %5, %6, %cst_7 {dimension_numbers = #tpu.dot_dimension_numbers<[1], [0], [0], [1], [0, 0, 1, 1], [], []>} : vector<8x128xf32>, vector<128x64xf32>, vector<8x64xf32> -> vector<8x64xf32>
    %c0_8 = arith.constant 0 : index
    %c0_9 = arith.constant 0 : index
    %8 = vector.load %arg5[%c0_8, %c0_9] : memref<1x64xf32, #tpu.memory_space<vmem>>, vector<1x64xf32>
    %9 = vector.broadcast %8 : vector<1x64xf32> to vector<8x64xf32>
    %10 = arith.addf %7, %9 : vector<8x64xf32>
    %c0_10 = arith.constant 0 : index
    %c0_11 = arith.constant 0 : index
    %11 = vector.load %arg7[%c0_10, %c0_11] : memref<8x128xf32, #tpu.memory_space<vmem>>, vector<8x128xf32>
    tpu.vector_store %arg7[%c0_10, %c0_11], %5 {strides = array<i32>} : memref<8x128xf32, #tpu.memory_space<vmem>>, vector<8x128xf32>,
    %c0_12 = arith.constant 0 : index
    %c0_13 = arith.constant 0 : index
    %12 = vector.load %arg6[%c0_12, %c0_13] : memref<8x64xf32, #tpu.memory_space<vmem>>, vector<8x64xf32>
    tpu.vector_store %arg6[%c0_12, %c0_13], %10 {strides = array<i32>} : memref<8x64xf32, #tpu.memory_space<vmem>>, vector<8x64xf32>,
    return
  }
  func.func @transform_0(%arg0: i32) -> (i32, i32) {
    %c0_i32 = arith.constant 0 : i32
    %c0_i32_0 = arith.constant 0 : i32
    return %arg0, %c0_i32 : i32, i32
  }
  func.func @transform_1(%arg0: i32) -> (i32, i32) {
    %c0_i32 = arith.constant 0 : i32
    %c0_i32_0 = arith.constant 0 : i32
    %c0_i32_1 = arith.constant 0 : i32
    return %c0_i32, %c0_i32_0 : i32, i32
  }
  func.func @transform_2(%arg0: i32) -> (i32, i32) {
    %c0_i32 = arith.constant 0 : i32
    %c0_i32_0 = arith.constant 0 : i32
    %c0_i32_1 = arith.constant 0 : i32
    return %c0_i32, %c0_i32_0 : i32, i32
  }
  func.func @transform_3(%arg0: i32) -> (i32, i32) {
    %c0_i32 = arith.constant 0 : i32
    %c0_i32_0 = arith.constant 0 : i32
    %c0_i32_1 = arith.constant 0 : i32
    return %c0_i32, %c0_i32_0 : i32, i32
  }
  func.func @transform_4(%arg0: i32) -> (i32, i32) {
    %c0_i32 = arith.constant 0 : i32
    %c0_i32_0 = arith.constant 0 : i32
    %c0_i32_1 = arith.constant 0 : i32
    return %c0_i32, %c0_i32_0 : i32, i32
  }
  func.func @transform_5(%arg0: i32) -> (i32, i32) {
    %c0_i32 = arith.constant 0 : i32
    %c0_i32_0 = arith.constant 0 : i32
    return %arg0, %c0_i32 : i32, i32
  }
  func.func @transform_6(%arg0: i32) -> (i32, i32) {
    %c0_i32 = arith.constant 0 : i32
    %c0_i32_0 = arith.constant 0 : i32
    return %arg0, %c0_i32 : i32, i32
  }
}

</mosaic_0001>

<bundles_post_ra>
// kernel: vae_forward.1
= control target key start
LH: loop header
LB: loop body
LE: loop exit
PB: predicated region body
PF: predicated region fallthrough
CT: control target
= control target key end

     0   :  { %v337_v0 = vmov 0.0|0.0   ;;  %vm338_vm0 = vmmov 0   ;;  %v339_v4 = vmov 0.0   ;;  %vm38_vm1 = vcmask 523264   ;;  %s476_s1 = inlined_call_operand.vmem [shape: f32[64,128], index: 1, kind: input, shape index: {}]   ;;  %s477_s3 = inlined_call_operand.vmem [shape: f32[128,64], index: 3, kind: input, shape index: {}]   ;;  %s478_s0 = inlined_call_operand.vmem [shape: f32[8,64], index: 0, kind: input, shape index: {}]   ;;  %s479_s2 = inlined_call_operand.vmem [shape: f32[1,128], index: 2, kind: input, shape index: {}]   ;;  %s480_s6 = inlined_call_operand.vmem [shape: f32[8,128], index: 6, kind: output, shape index: {1}]   ;;  %s481_s4 = inlined_call_operand.vmem [shape: f32[1,64], index: 4, kind: input, shape index: {}]   ;;  %s482_s5 = inlined_call_operand.vmem [shape: f32[8,64], index: 5, kind: output, shape index: {0}]  }
   0x1   :  { %298 = vmatprep.subr.bf16.mxu0 %v337_v0  ;;  %v23_v1 = vld [vmem:[%s476_s1] sm:$0xff]  ;;  %v24_v2 = vld [vmem:[%s476_s1 + $0x8] sm:$0xff]  ;;  %v25_v3 = vld [vmem:[%s476_s1 + $0x10] sm:$0xff]  ;;  %260 = vmatprep.mubr.msk.f32.mxu0 %vm338_vm0, %v339_v4 }
   0x2   :  { %v299_v5 = vpack.c.bf16 %v24_v2, %v23_v1  ;;  %v26_v6 = vld [vmem:[%s476_s1 + $0x18] sm:$0xff]  ;;  %310 = vmatprep.subr.bf16.mxu1 %v337_v0  ;;  %295 = vmatprep.mubr.msk.f32.mxu1 %vm338_vm0, %v339_v4  ;;  %v112_v8 = vld [vmem:[%s477_s3] sm:$0xff]  ;;  %v113_v9 = vld [vmem:[%s477_s3 + $0x8] sm:$0xff] }
   0x3   :  { %v302_v7 = vpack.c.bf16 %v26_v6, %v25_v3  ;;  %v114_v10 = vld [vmem:[%s477_s3 + $0x10] sm:$0xff]  ;;  %v27_v11 = vld [vmem:[%s476_s1 + $0x20] sm:$0xff]  ;;  %v28_v12 = vld [vmem:[%s476_s1 + $0x28] sm:$0xff]  ;;  %v311_v13 = vpack.c.bf16 %v113_v9, %v112_v8 }
   0x4   :  { %300 = vmatpush3.bf16.msra.mxu0 %v299_v5  ;;  %v115_v14 = vld [vmem:[%s477_s3 + $0x18] sm:$0xff]  ;;  %v305_v16 = vpack.c.bf16 %v28_v12, %v27_v11  ;;  %v116_v17 = vld [vmem:[%s477_s3 + $0x20] sm:$0xff]  ;;  %v117_v18 = vld [vmem:[%s477_s3 + $0x28] sm:$0xff] }
   0x5   :  { %301 = vmatprep.subr.bf16.mxu0 %v337_v0  ;;  %312 = vmatpush3.bf16.msra.mxu1 %v311_v13  ;;  %v314_v15 = vpack.c.bf16 %v115_v14, %v114_v10  ;;  %v29_v19 = vld [vmem:[%s476_s1 + $0x30] sm:$0xff]  ;;  %v30_v20 = vld [vmem:[%s476_s1 + $0x38] sm:$0xff]  ;;  %v317_v21 = vpack.c.bf16 %v117_v18, %v116_v17  ;;  %v22_v26 = vld [vmem:[%s478_s0] sm:$0xff] }
   0x6   :  { %313 = vmatprep.subr.bf16.mxu1 %v337_v0  ;;  %v308_v22 = vpack.c.bf16 %v30_v20, %v29_v19  ;;  %v118_v23 = vld [vmem:[%s477_s3 + $0x30] sm:$0xff]  ;;  %v119_v24 = vld [vmem:[%s477_s3 + $0x38] sm:$0xff]  ;;  %v120_v27 = vld [vmem:[%s477_s3 + $0x40] sm:$0xff] }
   0x7   :  { %v320_v25 = vpack.c.bf16 %v119_v24, %v118_v23  ;;  %v121_v28 = vld [vmem:[%s477_s3 + $0x48] sm:$0xff]  ;;  %v122_v30 = vld [vmem:[%s477_s3 + $0x50] sm:$0xff]  ;;  %v123_v31 = vld [vmem:[%s477_s3 + $0x58] sm:$0xff] }
   0x8   :  { %303 = vmatpush3.bf16.msra.mxu0 %v302_v7  ;;  %v323_v29 = vpack.c.bf16 %v121_v28, %v120_v27  ;;  %v326_v32 = vpack.c.bf16 %v123_v31, %v122_v30  ;;  %v124_v33 = vld [vmem:[%s477_s3 + $0x60] sm:$0xff]  ;;  %v125_v34 = vld [vmem:[%s477_s3 + $0x68] sm:$0xff]  ;;  %v126_v36 = vld [vmem:[%s477_s3 + $0x70] sm:$0xff] }
   0x9   :  { %304 = vmatprep.subr.bf16.mxu0 %v337_v0  ;;  %315 = vmatpush3.bf16.msra.mxu1 %v314_v15  ;;  %v329_v35 = vpack.c.bf16 %v125_v34, %v124_v33  ;;  %v127_v37 = vld [vmem:[%s477_s3 + $0x78] sm:$0xff]  ;;  %v215_v39 = vld [vmem:[%s479_s2] ss:$0 sm:$0xff] }
   0xa   :  { %316 = vmatprep.subr.bf16.mxu1 %v337_v0  ;;  %v332_v38 = vpack.c.bf16 %v127_v37, %v126_v36  ;;  %v217_v43 = vld [vmem:[%s481_s4] ss:$0 sm:$0xff] }
   0xc   :  { %306 = vmatpush3.bf16.msra.mxu0 %v305_v16 }
   0xd   :  { %307 = vmatprep.subr.bf16.mxu0 %v337_v0  ;;  %318 = vmatpush3.bf16.msra.mxu1 %v317_v21 }
   0xe   :  { %319 = vmatprep.subr.bf16.mxu1 %v337_v0 }
  0x10   :  { %309 = vmatpush3.bf16.msra.mxu0 %v308_v22 }
  0x11   :  { %321 = vmatpush3.bf16.msra.mxu1 %v320_v25 }
  0x12   :  { %322 = vmatprep.subr.bf16.mxu1 %v337_v0 }
  0x13   :  { %261 = vmatmul.mubr.msk.f32.vlgmr.msra.gmra.mrb[0].mxu0 %vm38_vm1, %v22_v26 }
  0x15   :  { %324 = vmatpush3.bf16.msra.mxu1 %v323_v29 }
  0x16   :  { %325 = vmatprep.subr.bf16.mxu1 %v337_v0 }
  0x19   :  { %327 = vmatpush3.bf16.msra.mxu1 %v326_v32 }
  0x1a   :  { %328 = vmatprep.subr.bf16.mxu1 %v337_v0 }
  0x1d   :  { %330 = vmatpush3.bf16.msra.mxu1 %v329_v35 }
  0x1e   :  { %331 = vmatprep.subr.bf16.mxu1 %v337_v0 }
  0x21   :  { %333 = vmatpush3.bf16.msra.mxu1 %v332_v38 }
  0xe6   :  { %v108_v40 = vpop.f32.mrb[0].mxu0 }
  0xe7   :  { %v109_v41 = vadd.f32 %v215_v39, %v108_v40  ;;  %v262_v42 = vpop.f32.mrb[1].mxu0 }
  0xe9   :  { %205 = vst [vmem:[%s480_s6] sm:$0xff] %v109_v41  ;;  %296 = vmatmul.mubr.f32.vlgmr.msra.gmra.mrb[0].mxu1 %v109_v41 }
 0x1bc   :  { %v201_v44 = vpop.f32.mrb[0].mxu1 }
 0x1bd   :  { %v202_v45 = vadd.f32 %v217_v43, %v201_v44  ;;  %v297_v46 = vpop.f32.mrb[1].mxu1 }
 0x1bf   :  { %206 = vst.msk [vmem:[%s482_s5] sm:$0xff] %vm38_vm1, %v202_v45 }

</bundles_post_ra>
